<compile_context>
chip_gen: v6e
topology: v6e:2x2x1
jax: 0.10.0
libtpu: 0.0.40
codegen_flags: <defaults>
</compile_context>

<pallas_src>
import functools

import jax
import jax.numpy as jnp
from jax.experimental import pallas as pl
from jax.experimental.pallas import tpu as pltpu


def mhsa_kernel(x_ref, wqkv_ref, bqkv_ref, wo_ref, bo_ref, o_ref, oheads_ref,
                *, heads, scale, compute_dtype):
    bb, n, d = x_ref.shape
    hd = d // heads
    # Flattened (bb*n, d) form is layout-free only when n is sublane-aligned.
    flat_ok = (n % 8) == 0

    # Load + cast x exactly once per batch block (reused by every head).
    x = x_ref[...].astype(compute_dtype)                       # (bb, n, d)

    wqkv = wqkv_ref[...]                                        # (d, 3d), resident
    bqkv = bqkv_ref[...]                                        # (1, 3d) f32

    # Single full-width QKV projection: contraction D, output width 3D (full MXU).
    if flat_ok:
        qkv = jnp.dot(x.reshape(bb * n, d), wqkv,
                      preferred_element_type=jnp.float32) + bqkv
        qkv = qkv.reshape(bb, n, 3 * d)                         # free: n % 8 == 0
    else:
        qkv = jnp.einsum('bnd,de->bne', x, wqkv,
                         preferred_element_type=jnp.float32) + bqkv

    # Softmax scale folded into q (N*D multiplies, not N*N per head).
    q = (qkv[:, :, 0:d] * scale).astype(compute_dtype)
    k = qkv[:, :, d:2 * d].astype(compute_dtype)
    v = qkv[:, :, 2 * d:3 * d].astype(compute_dtype)

    # Per-head attention: head axis handled inside the kernel (weights stay
    # resident; no extra grid steps).  Static unroll — `heads` is small.
    for h in range(heads):
        lo = h * hd
        qh = q[:, :, lo:lo + hd]                                # (bb, n, hd)
        kh = k[:, :, lo:lo + hd]
        vh = v[:, :, lo:lo + hd]

        # Scores with K^T fused into the contraction; f32 accumulation.
        s = jnp.einsum('bqd,bkd->bqk', qh, kh,
                       preferred_element_type=jnp.float32)      # (bb, n, n)
        s = s - jnp.max(s, axis=-1, keepdims=True)
        e = jnp.exp(s)
        denom = jnp.sum(e, axis=-1, keepdims=True)              # (bb, n, 1) f32

        # P@V first, exact normalization after (bb*n*hd divides, not bb*n*n).
        oh = jnp.einsum('bqk,bkd->bqd', e.astype(compute_dtype), vh,
                        preferred_element_type=jnp.float32)     # (bb, n, hd)
        oh = oh / denom

        oheads_ref[:, :, lo:lo + hd] = oh.astype(compute_dtype)

    # Single full-width output projection: contraction D, lane-dense full-D store.
    oall = oheads_ref[...]
    wo = wo_ref[...]                                            # (d, d), resident
    bo = bo_ref[...]                                            # (1, d) f32
    if flat_ok:
        out = jnp.dot(oall.reshape(bb * n, d), wo,
                      preferred_element_type=jnp.float32) + bo
        o_ref[...] = out.reshape(bb, n, d).astype(o_ref.dtype)
    else:
        out = jnp.einsum('bnd,de->bne', oall, wo,
                         preferred_element_type=jnp.float32) + bo
        o_ref[...] = out.astype(o_ref.dtype)


def _vmem_capacity_bytes():
    """Per-generation VMEM capacity; conservative (v7x) fallback."""
    try:
        info = pltpu.get_tpu_info()
        cap = getattr(info, "vmem_capacity_bytes", None)
        if cap:
            return int(cap)
    except Exception:
        pass
    return 64 * 1024 * 1024


def _per_step_vmem_bytes(bb, N, D, x_item, out_item, cdb):
    """Rough per-grid-step VMEM working set (double buffers + temporaries)."""
    weights = 2 * ((3 * D * D + D * D) * cdb + (3 * D + D) * 4)   # resident, 2-buffered
    xo = 2 * bb * N * D * x_item + 2 * bb * N * D * out_item      # x / out blocks
    scratch = bb * N * D * cdb                                    # per-head output scratch
    qkv_tmp = bb * N * 3 * D * (4 + cdb)                          # f32 qkv + bf16 q/k/v
    score_tmp = 3 * bb * N * N * 4                                # s / e / reductions
    proj_tmp = 2 * bb * N * D * 4                                 # f32 projection temps
    return weights + xo + scratch + qkv_tmp + score_tmp + proj_tmp


def multi_head_self_attention(x, w_qkv, b_qkv, w_out, b_out, *, heads,
                              block_b=None, compute_dtype=jnp.bfloat16):
    B, N, D = x.shape
    assert D % heads == 0, "dim must be divisible by heads"
    hd = D // heads
    scale = float(hd) ** -0.5

    x_item = jnp.dtype(x.dtype).itemsize
    cdb = jnp.dtype(compute_dtype).itemsize

    vmem_cap = _vmem_capacity_bytes()
    vmem_budget = int(0.55 * vmem_cap)          # leave headroom for Mosaic scratch

    if block_b is None:
        cands = [c for c in range(min(B, 32), 0, -1) if B % c == 0]
        fitting = [c for c in cands
                   if _per_step_vmem_bytes(c, N, D, x_item, x_item, cdb) <= vmem_budget]
        if not fitting:
            fitting = [1]
        block_b = fitting[0]
        # v7x has 2 TensorCores: keep >= 2 "parallel" grid points when possible.
        if B // block_b < 2:
            for c in fitting:
                if B // c >= 2:
                    block_b = c
                    break
    assert B % block_b == 0

    # ---- wrapper-side layout plumbing only (cheap XLA ops) ----
    wqkv = w_qkv.astype(compute_dtype)                            # (D, 3D)
    bqkv = b_qkv.reshape(1, 3 * D).astype(jnp.float32)
    wo = w_out.astype(compute_dtype)                              # (D, D)
    bo = b_out.reshape(1, D).astype(jnp.float32)

    kernel = functools.partial(mhsa_kernel, heads=heads, scale=scale,
                               compute_dtype=compute_dtype)

    per_step = _per_step_vmem_bytes(block_b, N, D, x_item, x_item, cdb)
    vmem_limit = int(min(0.85 * vmem_cap,
                         max(16 * 1024 * 1024, 1.5 * per_step)))

    flops = 2 * B * (4 * N * D * D + 2 * N * N * D)
    transcendentals = B * heads * N * N
    bytes_accessed = (x.size * x_item
                      + (wqkv.size + wo.size) * cdb
                      + (bqkv.size + bo.size) * 4
                      + B * N * D * x_item)

    return pl.pallas_call(
        kernel,
        out_shape=jax.ShapeDtypeStruct((B, N, D), x.dtype),
        grid_spec=pltpu.PrefetchScalarGridSpec(
            num_scalar_prefetch=0,
            grid=(B // block_b,),
            in_specs=[
                pl.BlockSpec((block_b, N, D), lambda b: (b, 0, 0)),  # x block
                pl.BlockSpec((D, 3 * D), lambda b: (0, 0)),          # W_qkv (resident)
                pl.BlockSpec((1, 3 * D), lambda b: (0, 0)),          # b_qkv (resident)
                pl.BlockSpec((D, D), lambda b: (0, 0)),              # W_out (resident)
                pl.BlockSpec((1, D), lambda b: (0, 0)),              # b_out (resident)
            ],
            out_specs=pl.BlockSpec((block_b, N, D), lambda b: (b, 0, 0)),
            scratch_shapes=[pltpu.VMEM((block_b, N, D), compute_dtype)],
        ),
        compiler_params=pltpu.CompilerParams(
            dimension_semantics=("parallel",),
            vmem_limit_bytes=vmem_limit),
        cost_estimate=pl.CostEstimate(
            flops=flops, transcendentals=transcendentals,
            bytes_accessed=bytes_accessed),
    )(x, wqkv, bqkv, wo, bo)


def reference_mhsa(x, w_qkv, b_qkv, w_out, b_out, *, heads):
    """Pure-JAX f32 reference mirroring the PyTorch forward."""
    B, N, D = x.shape
    hd = D // heads
    scale = float(hd) ** -0.5
    qkv = x @ w_qkv + b_qkv                                       # (B, N, 3D)
    q, k, v = jnp.split(qkv, 3, axis=-1)

    def to_heads(t):
        return t.reshape(B, N, heads, hd).transpose(0, 2, 1, 3)   # (B, H, N, hd)

    q, k, v = map(to_heads, (q, k, v))
    scores = jnp.einsum('bhqd,bhkd->bhqk', q, k) * scale
    attn = jax.nn.softmax(scores, axis=-1)
    out = jnp.einsum('bhqk,bhkd->bhqd', attn, v)
    out = out.transpose(0, 2, 1, 3).reshape(B, N, D)
    return out @ w_out + b_out


if __name__ == "__main__":
    B, N, D, heads = 2, 8, 32, 4

    key = jax.random.PRNGKey(0)
    kx, kw1, kb1, kw2, kb2 = jax.random.split(key, 5)

    bound = 1.0 / (D ** 0.5)
    x = jax.random.normal(kx, (B, N, D), dtype=jnp.float32)
    # nn.Linear(dim, dim*3): weight (3D, D) stored pre-transposed as (D, 3D)
    w_qkv = jax.random.uniform(kw1, (D, 3 * D), jnp.float32, -bound, bound)
    b_qkv = jax.random.uniform(kb1, (3 * D,), jnp.float32, -bound, bound)
    # nn.Linear(dim, dim): weight (D, D) stored pre-transposed as (D, D)
    w_out = jax.random.uniform(kw2, (D, D), jnp.float32, -bound, bound)
    b_out = jax.random.uniform(kb2, (D,), jnp.float32, -bound, bound)

    y = multi_head_self_attention(x, w_qkv, b_qkv, w_out, b_out, heads=heads)
    y = jax.block_until_ready(y)

    y_ref = reference_mhsa(x, w_qkv, b_qkv, w_out, b_out, heads=heads)
    assert y.shape == (B, N, D)
    # bf16 MXU operands (f32 accumulation, exact f32 softmax normalization) vs.
    # the pure-f32 reference.
    max_err = float(jnp.max(jnp.abs(y - y_ref)))
    assert max_err < 5e-2, f"mismatch vs reference, max abs err {max_err}"

    print("KERNEL_OK")
</pallas_src>

<mosaic_0001>
module attributes {stable_mosaic.version = 11 : i64} {
  func.func @mhsa_kernel(%arg0: i32, %arg1: memref<1x8x32xf32, #tpu.memory_space<vmem>>, %arg2: memref<32x96xbf16, #tpu.memory_space<vmem>>, %arg3: memref<1x96xf32, #tpu.memory_space<vmem>>, %arg4: memref<32x32xbf16, #tpu.memory_space<vmem>>, %arg5: memref<1x32xf32, #tpu.memory_space<vmem>>, %arg6: memref<1x8x32xf32, #tpu.memory_space<vmem>>, %arg7: memref<1x8x32xbf16, #tpu.memory_space<vmem>>) attributes {dimension_semantics = [#tpu.dimension_semantics<parallel>], iteration_bounds = array<i64: 2>, scalar_prefetch = 0 : i64, scratch_operands = 1 : i64, tpu.core_type = #tpu.core_type<tc>, window_params = [{transform_indices = @transform_0, window_bounds = array<i64: 1, 8, 32>}, {pipeline_mode = #tpu.pipeline_mode<synchronous>, transform_indices = @transform_1, window_bounds = array<i64: 32, 96>}, {pipeline_mode = #tpu.pipeline_mode<synchronous>, transform_indices = @transform_2, window_bounds = array<i64: 1, 96>}, {pipeline_mode = #tpu.pipeline_mode<synchronous>, transform_indices = @transform_3, window_bounds = array<i64: 32, 32>}, {pipeline_mode = #tpu.pipeline_mode<synchronous>, transform_indices = @transform_4, window_bounds = array<i64: 1, 32>}, {transform_indices = @transform_5, window_bounds = array<i64: 1, 8, 32>}]} {
    %c0 = arith.constant 0 : index
    %c0_0 = arith.constant 0 : index
    %c0_1 = arith.constant 0 : index
    %0 = vector.load %arg1[%c0, %c0_0, %c0_1] : memref<1x8x32xf32, #tpu.memory_space<vmem>>, vector<1x8x32xf32>
    %1 = arith.truncf %0 : vector<1x8x32xf32> to vector<1x8x32xbf16>
    %c0_2 = arith.constant 0 : index
    %c0_3 = arith.constant 0 : index
    %2 = vector.load %arg2[%c0_2, %c0_3] : memref<32x96xbf16, #tpu.memory_space<vmem>>, vector<32x96xbf16>
    %c0_4 = arith.constant 0 : index
    %c0_5 = arith.constant 0 : index
    %3 = vector.load %arg3[%c0_4, %c0_5] : memref<1x96xf32, #tpu.memory_space<vmem>>, vector<1x96xf32>
    %4 = vector.shape_cast %1 : vector<1x8x32xbf16> to vector<8x32xbf16>
    %cst = arith.constant dense<0.000000e+00> : vector<8x96xf32>
    %5 = tpu.matmul %4, %2, %cst {dimension_numbers = #tpu.dot_dimension_numbers<[1], [0], [0], [1], [0, 0, 1, 1], [], []>} : vector<8x32xbf16>, vector<32x96xbf16>, vector<8x96xf32> -> vector<8x96xf32>
    %6 = vector.broadcast %3 : vector<1x96xf32> to vector<8x96xf32>
    %7 = arith.addf %5, %6 : vector<8x96xf32>
    %8 = vector.shape_cast %7 : vector<8x96xf32> to vector<1x8x96xf32>
    %9 = vector.extract_strided_slice %8 {offsets = [0, 0, 0], sizes = [1, 8, 32], strides = [1, 1, 1]} : vector<1x8x96xf32> to vector<1x8x32xf32>
    %cst_6 = arith.constant 0.353553385 : f32
    %10 = vector.broadcast %cst_6 : f32 to vector<1x8x32xf32>
    %11 = arith.mulf %9, %10 : vector<1x8x32xf32>
    %12 = arith.truncf %11 : vector<1x8x32xf32> to vector<1x8x32xbf16>
    %13 = vector.extract_strided_slice %8 {offsets = [0, 0, 32], sizes = [1, 8, 32], strides = [1, 1, 1]} : vector<1x8x96xf32> to vector<1x8x32xf32>
    %14 = arith.truncf %13 : vector<1x8x32xf32> to vector<1x8x32xbf16>
    %15 = vector.extract_strided_slice %8 {offsets = [0, 0, 64], sizes = [1, 8, 32], strides = [1, 1, 1]} : vector<1x8x96xf32> to vector<1x8x32xf32>
    %16 = arith.truncf %15 : vector<1x8x32xf32> to vector<1x8x32xbf16>
    %17 = vector.extract_strided_slice %12 {offsets = [0, 0, 0], sizes = [1, 8, 8], strides = [1, 1, 1]} : vector<1x8x32xbf16> to vector<1x8x8xbf16>
    %18 = vector.extract_strided_slice %14 {offsets = [0, 0, 0], sizes = [1, 8, 8], strides = [1, 1, 1]} : vector<1x8x32xbf16> to vector<1x8x8xbf16>
    %19 = vector.extract_strided_slice %16 {offsets = [0, 0, 0], sizes = [1, 8, 8], strides = [1, 1, 1]} : vector<1x8x32xbf16> to vector<1x8x8xbf16>
    "tpu.trace_start"() <{level = 10 : i32, message = "bqd,bkd->bqk"}> : () -> ()
    %cst_7 = arith.constant dense<0.000000e+00> : vector<1x8x8xf32>
    %20 = tpu.matmul %17, %18, %cst_7 {dimension_numbers = #tpu.dot_dimension_numbers<[2], [2], [1], [1], [0, 0, 0, 1, 1, 1], [0], [0]>} : vector<1x8x8xbf16>, vector<1x8x8xbf16>, vector<1x8x8xf32> -> vector<1x8x8xf32>
    "tpu.trace_stop"() : () -> ()
    %cst_8 = arith.constant dense<0xFF800000> : vector<1x8xf32>
    %21 = vector.multi_reduction <maximumf>, %20, %cst_8 [2] : vector<1x8x8xf32> to vector<1x8xf32>
    %22 = vector.shape_cast %21 : vector<1x8xf32> to vector<1x8x1xf32>
    %23 = vector.broadcast %22 : vector<1x8x1xf32> to vector<1x8x8xf32>
    %24 = arith.subf %20, %23 : vector<1x8x8xf32>
    %25 = math.exp %24 : vector<1x8x8xf32>
    %cst_9 = arith.constant dense<0.000000e+00> : vector<1x8xf32>
    %26 = vector.multi_reduction <add>, %25, %cst_9 [2] : vector<1x8x8xf32> to vector<1x8xf32>
    %27 = vector.shape_cast %26 : vector<1x8xf32> to vector<1x8x1xf32>
    %28 = arith.truncf %25 : vector<1x8x8xf32> to vector<1x8x8xbf16>
    "tpu.trace_start"() <{level = 10 : i32, message = "bqk,bkd->bqd"}> : () -> ()
    %cst_10 = arith.constant dense<0.000000e+00> : vector<1x8x8xf32>
    %29 = tpu.matmul %28, %19, %cst_10 {dimension_numbers = #tpu.dot_dimension_numbers<[2], [1], [1], [2], [0, 0, 0, 1, 1, 2], [0], [0]>} : vector<1x8x8xbf16>, vector<1x8x8xbf16>, vector<1x8x8xf32> -> vector<1x8x8xf32>
    "tpu.trace_stop"() : () -> ()
    %30 = vector.broadcast %27 : vector<1x8x1xf32> to vector<1x8x8xf32>
    %31 = arith.divf %29, %30 : vector<1x8x8xf32>
    %32 = arith.truncf %31 : vector<1x8x8xf32> to vector<1x8x8xbf16>
    %c0_11 = arith.constant 0 : index
    %c0_12 = arith.constant 0 : index
    %c0_13 = arith.constant 0 : index
    %33 = vector.load %arg7[%c0_11, %c0_12, %c0_13] : memref<1x8x32xbf16, #tpu.memory_space<vmem>>, vector<1x8x8xbf16>
    tpu.vector_store %arg7[%c0_11, %c0_12, %c0_13], %32 {strides = array<i32>} : memref<1x8x32xbf16, #tpu.memory_space<vmem>>, vector<1x8x8xbf16>,
    %34 = vector.extract_strided_slice %12 {offsets = [0, 0, 8], sizes = [1, 8, 8], strides = [1, 1, 1]} : vector<1x8x32xbf16> to vector<1x8x8xbf16>
    %35 = vector.extract_strided_slice %14 {offsets = [0, 0, 8], sizes = [1, 8, 8], strides = [1, 1, 1]} : vector<1x8x32xbf16> to vector<1x8x8xbf16>
    %36 = vector.extract_strided_slice %16 {offsets = [0, 0, 8], sizes = [1, 8, 8], strides = [1, 1, 1]} : vector<1x8x32xbf16> to vector<1x8x8xbf16>
    "tpu.trace_start"() <{level = 10 : i32, message = "bqd,bkd->bqk"}> : () -> ()
    %cst_14 = arith.constant dense<0.000000e+00> : vector<1x8x8xf32>
    %37 = tpu.matmul %34, %35, %cst_14 {dimension_numbers = #tpu.dot_dimension_numbers<[2], [2], [1], [1], [0, 0, 0, 1, 1, 1], [0], [0]>} : vector<1x8x8xbf16>, vector<1x8x8xbf16>, vector<1x8x8xf32> -> vector<1x8x8xf32>
    "tpu.trace_stop"() : () -> ()
    %cst_15 = arith.constant dense<0xFF800000> : vector<1x8xf32>
    %38 = vector.multi_reduction <maximumf>, %37, %cst_15 [2] : vector<1x8x8xf32> to vector<1x8xf32>
    %39 = vector.shape_cast %38 : vector<1x8xf32> to vector<1x8x1xf32>
    %40 = vector.broadcast %39 : vector<1x8x1xf32> to vector<1x8x8xf32>
    %41 = arith.subf %37, %40 : vector<1x8x8xf32>
    %42 = math.exp %41 : vector<1x8x8xf32>
    %cst_16 = arith.constant dense<0.000000e+00> : vector<1x8xf32>
    %43 = vector.multi_reduction <add>, %42, %cst_16 [2] : vector<1x8x8xf32> to vector<1x8xf32>
    %44 = vector.shape_cast %43 : vector<1x8xf32> to vector<1x8x1xf32>
    %45 = arith.truncf %42 : vector<1x8x8xf32> to vector<1x8x8xbf16>
    "tpu.trace_start"() <{level = 10 : i32, message = "bqk,bkd->bqd"}> : () -> ()
    %cst_17 = arith.constant dense<0.000000e+00> : vector<1x8x8xf32>
    %46 = tpu.matmul %45, %36, %cst_17 {dimension_numbers = #tpu.dot_dimension_numbers<[2], [1], [1], [2], [0, 0, 0, 1, 1, 2], [0], [0]>} : vector<1x8x8xbf16>, vector<1x8x8xbf16>, vector<1x8x8xf32> -> vector<1x8x8xf32>
    "tpu.trace_stop"() : () -> ()
    %47 = vector.broadcast %44 : vector<1x8x1xf32> to vector<1x8x8xf32>
    %48 = arith.divf %46, %47 : vector<1x8x8xf32>
    %49 = arith.truncf %48 : vector<1x8x8xf32> to vector<1x8x8xbf16>
    %c0_18 = arith.constant 0 : index
    %c0_19 = arith.constant 0 : index
    %c8 = arith.constant 8 : index
    %50 = vector.load %arg7[%c0_18, %c0_19, %c8] : memref<1x8x32xbf16, #tpu.memory_space<vmem>>, vector<1x8x8xbf16>
    tpu.vector_store %arg7[%c0_18, %c0_19, %c8], %49 {strides = array<i32>} : memref<1x8x32xbf16, #tpu.memory_space<vmem>>, vector<1x8x8xbf16>,
    %51 = vector.extract_strided_slice %12 {offsets = [0, 0, 16], sizes = [1, 8, 8], strides = [1, 1, 1]} : vector<1x8x32xbf16> to vector<1x8x8xbf16>
    %52 = vector.extract_strided_slice %14 {offsets = [0, 0, 16], sizes = [1, 8, 8], strides = [1, 1, 1]} : vector<1x8x32xbf16> to vector<1x8x8xbf16>
    %53 = vector.extract_strided_slice %16 {offsets = [0, 0, 16], sizes = [1, 8, 8], strides = [1, 1, 1]} : vector<1x8x32xbf16> to vector<1x8x8xbf16>
    "tpu.trace_start"() <{level = 10 : i32, message = "bqd,bkd->bqk"}> : () -> ()
    %cst_20 = arith.constant dense<0.000000e+00> : vector<1x8x8xf32>
    %54 = tpu.matmul %51, %52, %cst_20 {dimension_numbers = #tpu.dot_dimension_numbers<[2], [2], [1], [1], [0, 0, 0, 1, 1, 1], [0], [0]>} : vector<1x8x8xbf16>, vector<1x8x8xbf16>, vector<1x8x8xf32> -> vector<1x8x8xf32>
    "tpu.trace_stop"() : () -> ()
    %cst_21 = arith.constant dense<0xFF800000> : vector<1x8xf32>
    %55 = vector.multi_reduction <maximumf>, %54, %cst_21 [2] : vector<1x8x8xf32> to vector<1x8xf32>
    %56 = vector.shape_cast %55 : vector<1x8xf32> to vector<1x8x1xf32>
    %57 = vector.broadcast %56 : vector<1x8x1xf32> to vector<1x8x8xf32>
    %58 = arith.subf %54, %57 : vector<1x8x8xf32>
    %59 = math.exp %58 : vector<1x8x8xf32>
    %cst_22 = arith.constant dense<0.000000e+00> : vector<1x8xf32>
    %60 = vector.multi_reduction <add>, %59, %cst_22 [2] : vector<1x8x8xf32> to vector<1x8xf32>
    %61 = vector.shape_cast %60 : vector<1x8xf32> to vector<1x8x1xf32>
    %62 = arith.truncf %59 : vector<1x8x8xf32> to vector<1x8x8xbf16>
    "tpu.trace_start"() <{level = 10 : i32, message = "bqk,bkd->bqd"}> : () -> ()
    %cst_23 = arith.constant dense<0.000000e+00> : vector<1x8x8xf32>
    %63 = tpu.matmul %62, %53, %cst_23 {dimension_numbers = #tpu.dot_dimension_numbers<[2], [1], [1], [2], [0, 0, 0, 1, 1, 2], [0], [0]>} : vector<1x8x8xbf16>, vector<1x8x8xbf16>, vector<1x8x8xf32> -> vector<1x8x8xf32>
    "tpu.trace_stop"() : () -> ()
    %64 = vector.broadcast %61 : vector<1x8x1xf32> to vector<1x8x8xf32>
    %65 = arith.divf %63, %64 : vector<1x8x8xf32>
    %66 = arith.truncf %65 : vector<1x8x8xf32> to vector<1x8x8xbf16>
    %c0_24 = arith.constant 0 : index
    %c0_25 = arith.constant 0 : index
    %c16 = arith.constant 16 : index
    %67 = vector.load %arg7[%c0_24, %c0_25, %c16] : memref<1x8x32xbf16, #tpu.memory_space<vmem>>, vector<1x8x8xbf16>
    tpu.vector_store %arg7[%c0_24, %c0_25, %c16], %66 {strides = array<i32>} : memref<1x8x32xbf16, #tpu.memory_space<vmem>>, vector<1x8x8xbf16>,
    %68 = vector.extract_strided_slice %12 {offsets = [0, 0, 24], sizes = [1, 8, 8], strides = [1, 1, 1]} : vector<1x8x32xbf16> to vector<1x8x8xbf16>
    %69 = vector.extract_strided_slice %14 {offsets = [0, 0, 24], sizes = [1, 8, 8], strides = [1, 1, 1]} : vector<1x8x32xbf16> to vector<1x8x8xbf16>
    %70 = vector.extract_strided_slice %16 {offsets = [0, 0, 24], sizes = [1, 8, 8], strides = [1, 1, 1]} : vector<1x8x32xbf16> to vector<1x8x8xbf16>
    "tpu.trace_start"() <{level = 10 : i32, message = "bqd,bkd->bqk"}> : () -> ()
    %cst_26 = arith.constant dense<0.000000e+00> : vector<1x8x8xf32>
    %71 = tpu.matmul %68, %69, %cst_26 {dimension_numbers = #tpu.dot_dimension_numbers<[2], [2], [1], [1], [0, 0, 0, 1, 1, 1], [0], [0]>} : vector<1x8x8xbf16>, vector<1x8x8xbf16>, vector<1x8x8xf32> -> vector<1x8x8xf32>
    "tpu.trace_stop"() : () -> ()
    %cst_27 = arith.constant dense<0xFF800000> : vector<1x8xf32>
    %72 = vector.multi_reduction <maximumf>, %71, %cst_27 [2] : vector<1x8x8xf32> to vector<1x8xf32>
    %73 = vector.shape_cast %72 : vector<1x8xf32> to vector<1x8x1xf32>
    %74 = vector.broadcast %73 : vector<1x8x1xf32> to vector<1x8x8xf32>
    %75 = arith.subf %71, %74 : vector<1x8x8xf32>
    %76 = math.exp %75 : vector<1x8x8xf32>
    %cst_28 = arith.constant dense<0.000000e+00> : vector<1x8xf32>
    %77 = vector.multi_reduction <add>, %76, %cst_28 [2] : vector<1x8x8xf32> to vector<1x8xf32>
    %78 = vector.shape_cast %77 : vector<1x8xf32> to vector<1x8x1xf32>
    %79 = arith.truncf %76 : vector<1x8x8xf32> to vector<1x8x8xbf16>
    "tpu.trace_start"() <{level = 10 : i32, message = "bqk,bkd->bqd"}> : () -> ()
    %cst_29 = arith.constant dense<0.000000e+00> : vector<1x8x8xf32>
    %80 = tpu.matmul %79, %70, %cst_29 {dimension_numbers = #tpu.dot_dimension_numbers<[2], [1], [1], [2], [0, 0, 0, 1, 1, 2], [0], [0]>} : vector<1x8x8xbf16>, vector<1x8x8xbf16>, vector<1x8x8xf32> -> vector<1x8x8xf32>
    "tpu.trace_stop"() : () -> ()
    %81 = vector.broadcast %78 : vector<1x8x1xf32> to vector<1x8x8xf32>
    %82 = arith.divf %80, %81 : vector<1x8x8xf32>
    %83 = arith.truncf %82 : vector<1x8x8xf32> to vector<1x8x8xbf16>
    %c0_30 = arith.constant 0 : index
    %c0_31 = arith.constant 0 : index
    %c24 = arith.constant 24 : index
    %84 = vector.load %arg7[%c0_30, %c0_31, %c24] : memref<1x8x32xbf16, #tpu.memory_space<vmem>>, vector<1x8x8xbf16>
    tpu.vector_store %arg7[%c0_30, %c0_31, %c24], %83 {strides = array<i32>} : memref<1x8x32xbf16, #tpu.memory_space<vmem>>, vector<1x8x8xbf16>,
    %c0_32 = arith.constant 0 : index
    %c0_33 = arith.constant 0 : index
    %c0_34 = arith.constant 0 : index
    %85 = vector.load %arg7[%c0_32, %c0_33, %c0_34] : memref<1x8x32xbf16, #tpu.memory_space<vmem>>, vector<1x8x32xbf16>
    %c0_35 = arith.constant 0 : index
    %c0_36 = arith.constant 0 : index
    %86 = vector.load %arg4[%c0_35, %c0_36] : memref<32x32xbf16, #tpu.memory_space<vmem>>, vector<32x32xbf16>
    %c0_37 = arith.constant 0 : index
    %c0_38 = arith.constant 0 : index
    %87 = vector.load %arg5[%c0_37, %c0_38] : memref<1x32xf32, #tpu.memory_space<vmem>>, vector<1x32xf32>
    %88 = vector.shape_cast %85 : vector<1x8x32xbf16> to vector<8x32xbf16>
    %cst_39 = arith.constant dense<0.000000e+00> : vector<8x32xf32>
    %89 = tpu.matmul %88, %86, %cst_39 {dimension_numbers = #tpu.dot_dimension_numbers<[1], [0], [0], [1], [0, 0, 1, 1], [], []>} : vector<8x32xbf16>, vector<32x32xbf16>, vector<8x32xf32> -> vector<8x32xf32>
    %90 = vector.broadcast %87 : vector<1x32xf32> to vector<8x32xf32>
    %91 = arith.addf %89, %90 : vector<8x32xf32>
    %92 = vector.shape_cast %91 : vector<8x32xf32> to vector<1x8x32xf32>
    %c0_40 = arith.constant 0 : index
    %c0_41 = arith.constant 0 : index
    %c0_42 = arith.constant 0 : index
    %93 = vector.load %arg6[%c0_40, %c0_41, %c0_42] : memref<1x8x32xf32, #tpu.memory_space<vmem>>, vector<1x8x32xf32>
    tpu.vector_store %arg6[%c0_40, %c0_41, %c0_42], %92 {strides = array<i32>} : memref<1x8x32xf32, #tpu.memory_space<vmem>>, vector<1x8x32xf32>,
    return
  }
  func.func @transform_0(%arg0: i32) -> (i32, i32, i32) {
    %c0_i32 = arith.constant 0 : i32
    %c0_i32_0 = arith.constant 0 : i32
    %c0_i32_1 = arith.constant 0 : i32
    return %arg0, %c0_i32, %c0_i32_0 : i32, i32, i32
  }
  func.func @transform_1(%arg0: i32) -> (i32, i32) {
    %c0_i32 = arith.constant 0 : i32
    %c0_i32_0 = arith.constant 0 : i32
    %c0_i32_1 = arith.constant 0 : i32
    return %c0_i32, %c0_i32_0 : i32, i32
  }
  func.func @transform_2(%arg0: i32) -> (i32, i32) {
    %c0_i32 = arith.constant 0 : i32
    %c0_i32_0 = arith.constant 0 : i32
    %c0_i32_1 = arith.constant 0 : i32
    return %c0_i32, %c0_i32_0 : i32, i32
  }
  func.func @transform_3(%arg0: i32) -> (i32, i32) {
    %c0_i32 = arith.constant 0 : i32
    %c0_i32_0 = arith.constant 0 : i32
    %c0_i32_1 = arith.constant 0 : i32
    return %c0_i32, %c0_i32_0 : i32, i32
  }
  func.func @transform_4(%arg0: i32) -> (i32, i32) {
    %c0_i32 = arith.constant 0 : i32
    %c0_i32_0 = arith.constant 0 : i32
    %c0_i32_1 = arith.constant 0 : i32
    return %c0_i32, %c0_i32_0 : i32, i32
  }
  func.func @transform_5(%arg0: i32) -> (i32, i32, i32) {
    %c0_i32 = arith.constant 0 : i32
    %c0_i32_0 = arith.constant 0 : i32
    %c0_i32_1 = arith.constant 0 : i32
    return %arg0, %c0_i32, %c0_i32_0 : i32, i32, i32
  }
}

</mosaic_0001>

<bundles_post_ra>
// kernel: tpu_custom_call.1
= control target key start
LH: loop header
LB: loop body
LE: loop exit
PB: predicated region body
PF: predicated region fallthrough
CT: control target
= control target key end

     0   :  { %10 = vsyncpa [#allocation4], 0  ;;  %s1672_s0 = inlined_call_operand.hbm [shape: f32[2,8,32], index: 0, kind: input, shape index: {}]   ;;  %s1673_s1 = inlined_call_operand.hbm [shape: bf16[32,96], index: 1, kind: input, shape index: {}]   ;;  %s1674_s2 = inlined_call_operand.vmem [shape: f32[1,96], index: 2, kind: input, shape index: {}]   ;;  %s1675_s3 = inlined_call_operand.hbm [shape: bf16[32,32], index: 3, kind: input, shape index: {}]   ;;  %s1676_s4 = inlined_call_operand.vmem [shape: f32[1,32], index: 4, kind: input, shape index: {}]   ;;  %s1677_s5 = inlined_call_operand.hbm [shape: f32[2,8,32], index: 5, kind: output, shape index: {}]  }
   0x1   :  { %12 = vsyncpa [#allocation4 + $0x1], 0 }
   0x2   :  { %13 = vsyncpa [#allocation7], 0 }
   0x3   :  { %14 = vsyncpa [#allocation5], 0 }
   0x4   :  { %16 = vsyncpa [#allocation5 + $0x1], 0  ;;  %s1416_s18 = smov 0   ;;  %s1418_s19 = smov 0  }
   0x5   :  { %s1420_s20 = smov 0   ;;  %s1422_s21 = smov 0  }
   0x6 LB: > { %s1437_s22 = sadd.s32 4294967295, %s1362_s21   ;;  %s985_s23 = sadd.s32 4294967294, %s1362_s21   ;;  %s1362_s21 = sphi %s1422_s21, %s1699_s21   ;;  %s1358_s20 = sphi %s1420_s20, %s1698_s20   ;;  %s1354_s19 = sphi %s1418_s19, %s1697_s19   ;;  %s1350_s18 = sphi %s1416_s18, %s1696_s18  }
   0x7   : > { %p42_p0 = scmp.ne.s32.totalorder %s1354_s19, %s1350_s18  ;;  %p1678_p1 = scmp.eq.s32.totalorder %s1437_s22, 0 }
   0x8   : > { %p156_p3 = scmp.eq.s32.totalorder %s985_s23, 1  ;;  %p986_p5 = scmp.ge.s32.totalorder %s1362_s21, 1 }
   0x9   : > { %p1446_p4 = por %p1678_p1, %p42_p0  ;;  %p163_p7 = scmp.lt.s32.totalorder %s1362_s21, 3 }
   0xa   : > { %p1451_p6 = por %p156_p3, %p42_p0  ;;  %s1364_s27 = smov [#allocation6]  }
   0xb   : > { %s1682_s24 = scalar_select %p1446_p4, 1, 0 }
   0xc   : > { %s1683_s25 = scalar_select %p1451_p6, 1, 0 }
   0xd   : > { %p1456_p8 = pnand %p986_p5, %p163_p7  ;;  %s175_s28 = sshll.u32 %s1364_s27, 4  ;;  %s176_s28 = int_to_ptr.vmem [resolvable:$true] %s175_s28 }
   0xe   : > { %s1365_s30 = smov [#allocation8]   ;;  %s1225_s7 = scalar_lea.vmem %s176_s28, 256 }
   0xf   : > { %s1684_s26 = scalar_select %p1456_p8, 1, 0 }
  0x10   : > { %p1121_p9 = pneg %p1456_p8  ;;  %s191_s6 = sshll.u32 %s1365_s30, 4  ;;  %s192_s6 = int_to_ptr.vmem [resolvable:$true] %s191_s6 }
  0x11   : > { %p1226_p13 = scmp.ne.s32.totalorder %s176_s28, %s1225_s7  ;;  %p1233_p5 = scmp.lt.s32.totalorder %s176_s28, %s176_s28 }
  0x12   : > { %p1465_p11 = pnand %p1121_p9, %p1678_p1  ;;  %p1234_p7 = scmp.lt.s32.totalorder %s1225_s7, %s1225_s7 }
  0x14   : > { %p1216_p12 = pneg %p1465_p11  ;;  %p1235_p10 = por %p1234_p7, %p1233_p5 }
  0x16   : > { %p1228_p0 = pnand %p1226_p13, %p1216_p12 }
  0x18   : > { %p1229_p3 = pneg %p1228_p0 }
  0x1a   : > { %p1236_p9 = pnand %p1235_p10, %p1229_p3 }
  0x1c   : > { %1239 = shalt.err (!%p1236_p9)
}
  0x1d   : > { %s1366_s8 = smov 64   ;;  %s1367_s9 = smov 4  }
  0x1e   : > { %1124 = dma.hbm_to_vmem [thread:$0]  (!%p1465_p11), %s1673_s1, 256, %s176_s28, [#allocation7], %s1366_s8, %s1366_s8, %s1367_s9  }
  0x1f   : > { %s1251_s12 = scalar_lea.vmem %s192_s6, 256  ;;  %p1259_p2 = scmp.lt.s32.totalorder %s192_s6, %s192_s6 }
  0x20   : > { %p1252_p1 = scmp.ne.s32.totalorder %s192_s6, %s1251_s12  ;;  %p1260_p6 = scmp.lt.s32.totalorder %s1251_s12, %s1251_s12 }
  0x22   : > { %p1254_p13 = pnand %p1252_p1, %p1216_p12  ;;  %p1261_p5 = por %p1260_p6, %p1259_p2 }
  0x24   : > { %p1255_p0 = pneg %p1254_p13 }
  0x26   : > { %p1262_p10 = pnand %p1261_p5, %p1255_p0 }
  0x28   : > { %1265 = shalt.err (!%p1262_p10)
}
  0x29   : > { %1127 = dma.hbm_to_vmem [thread:$0]  (!%p1465_p11), %s1675_s3, 256, %s192_s6, [#allocation7], %s1366_s8, %s1366_s8, %s1367_s9  }
  0x2a   : > { %s1488_s15 = sadd.s32 1, %s1362_s21   ;;  %s29_s16 = sadd.s32 1, %s1358_s20 }
  0x2b   : > { %s26_s17 = ssub.s32 %s1362_s21, %s1488_s15  ;;  %p36_p1 = scmp.ne.s32.totalorder %s1358_s20, %s1354_s19 }
  0x2c   : > { %p27_p2 = scmp.eq.s32.totalorder %s26_s17, 0  ;;  %p37_p6 = scmp.eq.s32.totalorder %s1362_s21, 0 }
  0x2d   : > { %p1686_p12 = scmp.eq.s32.totalorder %s1437_s22, 1  ;;  %p1138_p7 = scmp.lt.s32.totalorder %s1362_s21, 2 }
  0x2e   : > { %s1504_s27 = scalar_select %p27_p2, %s1358_s20, %s29_s16  }
  0x2f   : > { %p1498_p3 = por %p1686_p12, %p36_p1  ;;  %p38_p9 = por %p37_p6, %p36_p1 }
  0x30   : > { %s208_s28 = sand.u32 1, %s1358_s20   ;;  %s991_s30 = sshll.u32 %s1362_s21, 7 }
  0x31   : > { %s1687_s23 = scalar_select %p1498_p3, 1, 0 }
  0x32   : > { %s990_s29 = sshll.u32 %s208_s28, 3  ;;  %s1511_s8 = scalar_lea.hbm %s1672_s0, %s991_s30 }
  0x33   : > { %s212_s9 = scalar_lea.vmem [#allocation3], %s990_s29  ;;  %p1513_p11 = pnand %p1138_p7, %p38_p9 }
  0x34   : > { %s219_s10 = sshll.u32 %s212_s9, 4  ;;  %s209_s12 = scalar_lea.sflag [#allocation4], %s208_s28  ;;  %s220_s10 = int_to_ptr.vmem [resolvable:$true] %s219_s10 }
  0x35   : > { %s1266_s13 = scalar_lea.hbm %s1511_s8, 128  ;;  %p1268_p0 = pneg %p1513_p11 }
  0x36   : > { %p1267_p13 = scmp.ne.s32.totalorder %s1511_s8, %s1266_s13  ;;  %s1271_s17 = scalar_lea.hbm %s1672_s0, 256 }
  0x37   : > { %p1272_p1 = scmp.lt.s32.totalorder %s1511_s8, %s1672_s0  ;;  %p1273_p2 = scmp.lt.s32.totalorder %s1271_s17, %s1266_s13 }
  0x38   : > { %p1269_p5 = pnand %p1268_p0, %p1267_p13 }
  0x39   : > { %p1274_p6 = por %p1273_p2, %p1272_p1 }
  0x3a   : > { %p1270_p10 = pneg %p1269_p5 }
  0x3c   : > { %p1275_p12 = pnand %p1274_p6, %p1270_p10 }
  0x3e   : > { %1278 = shalt.err (!%p1275_p12)
}
  0x3f   : > { %s1279_s6 = scalar_lea.vmem %s220_s10, 128  ;;  %s1368_s28 = smov [#allocation3]  }
  0x40   : > { %p1280_p7 = scmp.ne.s32.totalorder %s220_s10, %s1279_s6  ;;  %s1284_s7 = sshll.u32 %s1368_s28, 4  ;;  %s1285_s7 = int_to_ptr.vmem [resolvable:$false] %s1284_s7 }
  0x41   : > { %s1286_s9 = scalar_lea.vmem %s1285_s7, 256  ;;  %p1287_p13 = scmp.lt.s32.totalorder %s220_s10, %s1285_s7 }
  0x42   : > { %p1282_p9 = pnand %p1280_p7, %p1268_p0  ;;  %p1288_p5 = scmp.lt.s32.totalorder %s1286_s9, %s1279_s6 }
  0x44   : > { %p1283_p3 = pneg %p1282_p9  ;;  %p1289_p4 = por %p1288_p5, %p1287_p13 }
  0x46   : > { %p1290_p8 = pnand %p1289_p4, %p1283_p3 }
  0x48   : > { %1293 = shalt.err (!%p1290_p8)
}
  0x49   : > { %1131 = dma.hbm_to_vmem [thread:$0]  (!%p1513_p11), %s1511_s8, 128, %s220_s10, %s209_s12  }
  0x4a   : > { %p1689_p10 = scmp.ne.s32.totalorder %s1684_s26, 0 }
  0x4b   : > { %s1534_s13 = sand.u32 (!%p1689_p10), 1, %s1354_s19   ;;  %p1690_p4 = scmp.ne.s32.totalorder (!%p1689_p10), %s1682_s24, 0 }
  0x4c   : > { %228 = sbr.rel (%p1689_p10) target bundleno = 1349 (0x545), region = 40  ;;  %s993_s14 = sshll.u32 (!%p1689_p10), %s1534_s13, 3 }
  0x4d   : > { %s231_s16 = scalar_lea.sflag (!%p1689_p10), [#allocation4], %s1534_s13  ;;  %s234_s17 = scalar_lea.vmem (!%p1689_p10), [#allocation3], %s993_s14 }
  0x51   : > { %1337 = dma.done.wait (%p1690_p4), %s231_s16, 128  }
  0x52   : > { %1339 = vsyncadd (%p1690_p4), %s231_s16, 4294967168  ;;  %p1691_p8 = scmp.eq.s32.totalorder %s1437_s22, 0 }
  0x54   : > { %1341 = dma.done.wait (%p1691_p8), [#allocation7], 512   ;;  %p1692_p3 = pmov %p1691_p8 }
  0x55   : > { %v1369_v0 = vmov 0.0   ;;  %vm1370_vm0 = vmmov 0   ;;  %v1194_v1 = vld [vmem:[#allocation6 + $0x8] sm:$0xff]   ;;  %v1195_v2 = vld [vmem:[#allocation6] sm:$0xff]   ;;  %v270_v3 = vld [vmem:[%s234_s17] sm:$0xff]  ;;  %vm295_vm1 = vcmask 261120  }
  0x56   : > { %1343 = vsyncadd (%p1692_p3), [#allocation7], 4294966784  ;;  %1045 = vmatprep.subr.bf16.mxu0 %v1369_v0  ;;  %1049 = vmatprep.mubr.msk.bf16.mxu0 %vm1370_vm0, %v1369_v0  ;;  %v271_v4 = vpack.c.bf16 %v270_v3, %v270_v3  ;;  %v997_v5 = vld [vmem:[%s1674_s2] ss:$0 sm:$0xff]  ;;  %s1371_s8 = smov 96   ;;  %s1372_s10 = smov 120  }
  0x57   : > { %1053 = vmatprep.subr.bf16.mxu1 %v1369_v0  ;;  %1055 = vmatprep.mubr.msk.bf16.mxu1 %vm1370_vm0, %v1369_v0  ;;  %s1373_s11 = smov 88   ;;  %s1374_s12 = smov 80   ;;  %vm345_vm2 = vcmask 64512   ;;  %vm407_vm3 = vcmask 1043456   ;;  %vm454_vm4 = vcmask 60416   ;;  %vm574_vm5 = vcmask 126016  }
  0x58   : > { %1046 = vmatpush3.bf16.msra.mxu0 %v1194_v1  ;;  %s1375_s30 = smov 112   ;;  %s1376_s29 = smov 72   ;;  %vm693_vm6 = vcmask 191616   ;;  %vm812_vm7 = vcmask 257216  }
  0x59   : > { %1047 = vmatprep.subr.bf16.mxu0 %v1369_v0  ;;  %s1377_s6 = smov 104   ;;  %s1378_s28 = smov 56  }
  0x5a   : > { %s1379_s7 = smov 64   ;;  %s1380_s9 = smov 40  }
  0x5b   : > { %s1381_s16 = smov 48   ;;  %s1382_s17 = smov 8  }
  0x5c   : > { %1048 = vmatpush3.bf16.msra.mxu0 %v1195_v2  ;;  %s1383_s24 = smov 16   ;;  %s1384_s26 = smov 24  }
  0x5d   : > { %1059 = vmatprep.subr.bf16.mxu0 %v1369_v0  ;;  %p1693_p0 = scmp.ne.s32.totalorder %s1687_s23, 0 }
  0x5f   : > { %1050 = vmatmul.mubr.msk.bf16.vlgmr.msra.gmra.mxu0 %vm295_vm1, %v271_v4 }
  0x60   : > { %1061 = vmatprep.mubr.msk.bf16.mxu0 %vm1370_vm0, %v1369_v0 }
 0x11f   : > { %v333_v6 = vpop.f32.mrf.mxu0 }
 0x120   : > { %v334_v7 = vadd.f32 %v997_v5, %v333_v6 }
 0x121   : > { %v1051_v8 = vpop.f32.mrf.mxu0 }
 0x122   : > { %v339_v9 = vmul.f32 0.35355338, %v334_v7  ;;  %v1562_v10 = vpack.c.bf16 %v334_v7, %v334_v7 }
 0x123   : > { %v336_v11 = vpop.f32.mrf.mxu0 }
 0x124   : > { %v340_v12 = vpack.c.bf16 %v339_v9, %v339_v9  ;;  %343 = vrot.lane.b32.xlu0 %v1562_v10, %s1371_s8 }
 0x125   : > { %v1052_v13 = vpop.f32.mrf.mxu0 }
 0x126   : > { %457 = vrot.lane.b32.xlu1 %v340_v12, %s1372_s10 }
 0x128   : > { %459 = vrot.lane.b32.xlu0 %v1562_v10, %s1373_s11  ;;  %s1017_s11 = sshll.u32 %s1437_s22, 7  ;;  %s883_s22 = scalar_lea.sflag [#allocation5], %s1534_s13 }
 0x12a   : > { %578 = vrot.lane.b32.xlu1 %v1562_v10, %s1374_s12  ;;  %s268_s12 = scalar_lea.vmem [#allocation9], %s993_s14  ;;  %s1385_s14 = smov [#allocation9]  }
 0x12c   : > { %576 = vrot.lane.b32.xlu0 %v340_v12, %s1375_s30  ;;  %s896_s30 = sshll.u32 %s268_s12, 4  ;;  %s1630_s30 = int_to_ptr.vmem [resolvable:$true] %s896_s30 }
 0x12e   : > { %697 = vrot.lane.b32.xlu1 %v1562_v10, %s1376_s29 }
 0x130   : > { %695 = vrot.lane.b32.xlu0 %v340_v12, %s1377_s6 }
 0x196   : > { %v344_v14 = vpop.permute.xlu0 %343 }
 0x197   : > { %v350_v15 = vsel %vm345_vm2, %v344_v14, 0 }
 0x198   : > { %1054 = vmatpush3.bf16.xpose.msra.mxu1 %v350_v15  ;;  %v458_v17 = vpop.permute.xlu1 %457 }
 0x199   : > { %1065 = vmatprep.subr.bf16.mxu1 %v1369_v0 }
 0x19a   : > { %v460_v16 = vpop.permute.xlu0 %459 }
 0x19b   : > { %v465_v18 = vsel %vm345_vm2, %v460_v16, 0 }
 0x19c   : > { %v579_v19 = vpop.permute.xlu1 %578 }
 0x19d   : > { %v584_v20 = vsel %vm345_vm2, %v579_v19, 0 }
 0x19e   : > { %v577_v22 = vpop.permute.xlu0 %576 }
 0x19f   : > { %1056 = vmatmul.mubr.msk.bf16.vlgmr.msra.gmra.mxu1 %vm345_vm2, %v340_v12 }
 0x1a0   : > { %1066 = vmatpush3.bf16.xpose.msra.mxu1 %v465_v18  ;;  %1067 = vmatprep.mubr.msk.bf16.mxu1 %vm1370_vm0, %v1369_v0  ;;  %v698_v21 = vpop.permute.xlu1 %697 }
 0x1a1   : > { %1077 = vmatprep.subr.bf16.mxu1 %v1369_v0  ;;  %v703_v23 = vsel %vm345_vm2, %v698_v21, 0 }
 0x1a2   : > { %v696_v24 = vpop.permute.xlu0 %695 }
 0x1a7   : > { %1068 = vmatmul.mubr.msk.bf16.vlgmr.msra.gmra.mxu1 %vm345_vm2, %v458_v17 }
 0x1a8   : > { %1078 = vmatpush3.bf16.xpose.msra.mxu1 %v584_v20  ;;  %1079 = vmatprep.mubr.msk.bf16.mxu1 %vm1370_vm0, %v1369_v0 }
 0x1a9   : > { %1089 = vmatprep.subr.bf16.mxu1 %v1369_v0 }
 0x1af   : > { %1080 = vmatmul.mubr.msk.bf16.vlgmr.msra.gmra.mxu1 %vm345_vm2, %v577_v22 }
 0x1b0   : > { %1090 = vmatpush3.bf16.xpose.msra.mxu1 %v703_v23  ;;  %1091 = vmatprep.mubr.msk.bf16.mxu1 %vm1370_vm0, %v1369_v0 }
 0x1b1   : > { %1101 = vmatprep.subr.bf16.mxu1 %v1369_v0 }
 0x1b7   : > { %1092 = vmatmul.mubr.msk.bf16.vlgmr.msra.gmra.mxu1 %vm345_vm2, %v696_v24 }
 0x1b8   : > { %1105 = vmatprep.mubr.msk.bf16.mxu1 %vm1370_vm0, %v1369_v0 }
 0x25f   : > { %v386_v25 = vpop.f32.mrf.mxu1 }
 0x260   : > { %v392_v26 = vsel %vm345_vm2, %v386_v25, -inf }
 0x261   : > { %393 = vmax.xlane.f32.xlu1 %v392_v26  ;;  %v1057_v27 = vpop.f32.mrf.mxu1 }
 0x263   : > { %v389_v28 = vpop.f32.mrf.mxu1 }
 0x265   : > { %v1058_v29 = vpop.f32.mrf.mxu1 }
 0x267   : > { %v501_v30 = vpop.f32.mrf.mxu1 }
 0x268   : > { %v507_v31 = vsel %vm345_vm2, %v501_v30, -inf }
 0x269   : > { %508 = vmax.xlane.f32.xlu0 %v507_v31  ;;  %v1069_v32 = vpop.f32.mrf.mxu1 }
 0x26b   : > { %v504_v33 = vpop.f32.mrf.mxu1 }
 0x26d   : > { %v1070_v34 = vpop.f32.mrf.mxu1 }
 0x26f   : > { %v620_v35 = vpop.f32.mrf.mxu1 }
 0x270   : > { %v626_v36 = vsel %vm345_vm2, %v620_v35, -inf }
 0x271   : > { %627 = vmax.xlane.f32.xlu0 %v626_v36  ;;  %v1081_v37 = vpop.f32.mrf.mxu1 }
 0x272   : > { %517 = vrot.lane.b32.xlu1 %v1562_v10, %s1378_s28  ;;  %v1196_v37 = vld [vmem:[#allocation8 + $0x8] sm:$0xff]   ;;  %s1628_s28 = scalar_lea.hbm %s1677_s5, %s1017_s11 }
 0x273   : > { %v623_v38 = vpop.f32.mrf.mxu1  ;;  %1102 = vmatpush3.bf16.msra.mxu1 %v1196_v37 }
 0x274   : > { %1103 = vmatprep.subr.bf16.mxu1 %v1369_v0 }
 0x275   : > { %v1082_v39 = vpop.f32.mrf.mxu1 }
 0x276   : > { %v1197_v39 = vld [vmem:[#allocation8] sm:$0xff]  }
 0x277   : > { %v739_v40 = vpop.f32.mrf.mxu1  ;;  %1104 = vmatpush3.bf16.msra.mxu1 %v1197_v39 }
 0x278   : > { %v745_v44 = vsel %vm345_vm2, %v739_v40, -inf }
 0x279   : > { %v1093_v41 = vpop.f32.mrf.mxu1 }
 0x27b   : > { %v742_v42 = vpop.f32.mrf.mxu1 }
 0x27d   : > { %v1094_v43 = vpop.f32.mrf.mxu1 }
 0x287   : > { %402 = vrot.lane.b32.xlu0 %v1562_v10, %s1379_s7  ;;  %s1294_s7 = scalar_lea.vmem %s1630_s30, 128 }
 0x288   : > { %p1295_p11 = scmp.ne.s32.totalorder %s1630_s30, %s1294_s7 }
 0x28a   : > { %p1296_p1 = pnand %p1295_p11, %p1693_p0 }
 0x28b   : > { %755 = vrot.lane.b32.xlu0 %v1562_v10, %s1380_s9  ;;  %s1298_s9 = sshll.u32 %s1385_s14, 4  ;;  %s1299_s9 = int_to_ptr.vmem [resolvable:$false] %s1298_s9 }
 0x28c   : > { %p1297_p2 = pneg %p1296_p1  ;;  %p1301_p6 = scmp.lt.s32.totalorder %s1630_s30, %s1299_s9 }
 0x296   : > { %746 = vmax.xlane.f32.xlu1 %v745_v44 }
 0x2a7   : > { %636 = vrot.lane.b32.xlu1 %v1562_v10, %s1381_s16  ;;  %s1300_s16 = scalar_lea.vmem %s1299_s9, 256 }
 0x2a8   : > { %p1302_p12 = scmp.lt.s32.totalorder %s1300_s16, %s1294_s7 }
 0x2aa   : > { %p1303_p7 = por %p1302_p12, %p1301_p6 }
 0x2ac   : > { %p1304_p9 = pnand %p1303_p7, %p1297_p2 }
 0x2ea   : > { %v394_v45 = vpop.xlane.xlu1 %393 }
 0x2eb   : > { %v395_v46 = vsub.f32 %v386_v25, %v394_v45 }
 0x2ed   : > { %v396_v47 = vmul.f32 1.442695, %v395_v46 }
 0x2ee   : > { %v518_v57 = vpop.permute.xlu1 %517 }
 0x2ef   : > { %1198 = vpow2.f32 %v396_v47  ;;  %v523_v59 = vsel %vm407_vm3, %v518_v57, 0 }
 0x2f2   : > { %v509_v48 = vpop.xlane.xlu0 %508 }
 0x2f3   : > { %v510_v49 = vsub.f32 %v501_v30, %v509_v48 }
 0x2f5   : > { %v511_v50 = vmul.f32 1.442695, %v510_v49 }
 0x2f7   : > { %1200 = vpow2.f32 %v511_v50 }
 0x2fa   : > { %v628_v51 = vpop.xlane.xlu0 %627 }
 0x2fb   : > { %v629_v52 = vsub.f32 %v620_v35, %v628_v51  ;;  %v1012_v51 = vld [vmem:[%s1676_s4] ss:$0 sm:$0xff] }
 0x2fc   : > { %v1199_v54 = vpop.eup %1198 }
 0x2fd   : > { %v630_v53 = vmul.f32 1.442695, %v629_v52  ;;  %v401_v58 = vpack.c.bf16 %v1199_v54, %v1199_v54  ;;  %v398_v62 = vsel %vm345_vm2, %v1199_v54, 0.0 }
 0x2fe   : > { %v403_v55 = vpop.permute.xlu0 %402 }
 0x2ff   : > { %1202 = vpow2.f32 %v630_v53  ;;  %v409_v56 = vsel %vm407_vm3, %v403_v55, 0 }
 0x300   : > { %1060 = vmatpush3.bf16.msra.mxu0 %v409_v56 }
 0x301   : > { %1071 = vmatprep.subr.bf16.mxu0 %v1369_v0 }
 0x302   : > { %v756_v8 = vpop.permute.xlu0 %755 }
 0x303   : > { %1062 = vmatmul.mubr.msk.bf16.vlgmr.msra.gmra.mxu0 %vm345_vm2, %v401_v58  ;;  %v761_v10 = vsel %vm407_vm3, %v756_v8, 0 }
 0x304   : > { %v1201_v60 = vpop.eup %1200  ;;  %1072 = vmatpush3.bf16.msra.mxu0 %v523_v59  ;;  %1073 = vmatprep.mubr.msk.bf16.mxu0 %vm1370_vm0, %v1369_v0 }
 0x305   : > { %v513_v61 = vsel %vm345_vm2, %v1201_v60, 0.0  ;;  %1083 = vmatprep.subr.bf16.mxu0 %v1369_v0  ;;  %v516_v63 = vpack.c.bf16 %v1201_v60, %v1201_v60 }
 0x306   : > { %514 = vadd.xlane.f32.xlu1 %v513_v61 }
 0x30a   : > { %399 = vadd.xlane.f32.xlu1 %v398_v62 }
 0x30b   : > { %1074 = vmatmul.mubr.msk.bf16.vlgmr.msra.gmra.mxu0 %vm345_vm2, %v516_v63 }
 0x30c   : > { %v1203_v1 = vpop.eup %1202  ;;  %1085 = vmatprep.mubr.msk.bf16.mxu0 %vm1370_vm0, %v1369_v0 }
 0x30d   : > { %v632_v2 = vsel %vm345_vm2, %v1203_v1, 0.0  ;;  %v635_v9 = vpack.c.bf16 %v1203_v1, %v1203_v1 }
 0x30e   : > { %633 = vadd.xlane.f32.xlu0 %v632_v2 }
 0x31f   : > { %v747_v3 = vpop.xlane.xlu1 %746 }
 0x320   : > { %v748_v4 = vsub.f32 %v739_v40, %v747_v3 }
 0x322   : > { %v749_v5 = vmul.f32 1.442695, %v748_v4 }
 0x323   : > { %v637_v6 = vpop.permute.xlu1 %636 }
 0x324   : > { %1204 = vpow2.f32 %v749_v5  ;;  %v642_v7 = vsel %vm407_vm3, %v637_v6, 0 }
 0x325   : > { %1084 = vmatpush3.bf16.msra.mxu0 %v642_v7 }
 0x326   : > { %1095 = vmatprep.subr.bf16.mxu0 %v1369_v0 }
 0x328   : > { %1086 = vmatmul.mubr.msk.bf16.vlgmr.msra.gmra.mxu0 %vm345_vm2, %v635_v9 }
 0x329   : > { %1096 = vmatpush3.bf16.msra.mxu0 %v761_v10  ;;  %1097 = vmatprep.mubr.msk.bf16.mxu0 %vm1370_vm0, %v1369_v0 }
 0x331   : > { %v1205_v11 = vpop.eup %1204 }
 0x332   : > { %v751_v12 = vsel %vm345_vm2, %v1205_v11, 0.0  ;;  %v754_v13 = vpack.c.bf16 %v1205_v11, %v1205_v11 }
 0x333   : > { %752 = vadd.xlane.f32.xlu0 %v751_v12 }
 0x334   : > { %1098 = vmatmul.mubr.msk.bf16.vlgmr.msra.gmra.mxu0 %vm345_vm2, %v754_v13 }
 0x38f   : > { %v515_v14 = vpop.xlane.xlu1 %514 }
 0x393   : > { %v400_v15 = vpop.xlane.xlu1 %399 }
 0x394   : > { %1206 = vrcp.f32 %v400_v15 }
 0x395   : > { %1208 = vrcp.f32 %v515_v14 }
 0x397   : > { %v634_v30 = vpop.xlane.xlu0 %633 }
 0x398   : > { %1210 = vrcp.f32 %v634_v30 }
 0x3a1   : > { %v1207_v16 = vpop.eup %1206 }
 0x3a2   : > { %v1209_v23 = vpop.eup %1208 }
 0x3a5   : > { %v1211_v32 = vpop.eup %1210 }
 0x3bc   : > { %v753_v31 = vpop.xlane.xlu0 %752 }
 0x3bd   : > { %1212 = vrcp.f32 %v753_v31 }
 0x3c3   : > { %v445_v17 = vpop.f32.mrf.mxu0 }
 0x3c4   : > { %v452_v18 = vmul.f32 %v1207_v16, %v445_v17 }
 0x3c5   : > { %v1063_v19 = vpop.f32.mrf.mxu0 }
 0x3c6   : > { %v453_v20 = vpack.c.bf16 %v452_v18, %v452_v18 }
 0x3c7   : > { %v448_v21 = vpop.f32.mrf.mxu0 }
 0x3c8   : > { %455 = vst.msk [vmem:[#allocation2] sm:$0xf] %vm454_vm4, %v453_v20 }
 0x3c9   : > { %v1064_v22 = vpop.f32.mrf.mxu0 }
 0x3ca   : > { %v1213_v41 = vpop.eup %1212 }
 0x3cb   : > { %v559_v24 = vpop.f32.mrf.mxu0 }
 0x3cc   : > { %v566_v25 = vmul.f32 %v1209_v23, %v559_v24 }
 0x3cd   : > { %v1075_v26 = vpop.f32.mrf.mxu0 }
 0x3ce   : > { %v1020_v27 = vpack.c.bf16 %v566_v25, %v566_v25 }
 0x3cf   : > { %v562_v28 = vpop.f32.mrf.mxu0 }
 0x3d0   : > { %571 = vrot.lane.b32.xlu0 %v1020_v27, %s1382_s17 }
 0x3d1   : > { %v1076_v29 = vpop.f32.mrf.mxu0 }
 0x3e8   : > { %v678_v33 = vpop.f32.mrf.mxu0 }
 0x3e9   : > { %v685_v34 = vmul.f32 %v1211_v32, %v678_v33 }
 0x3ea   : > { %v1087_v35 = vpop.f32.mrf.mxu0 }
 0x3eb   : > { %v1021_v36 = vpack.c.bf16 %v685_v34, %v685_v34 }
 0x3ec   : > { %v681_v38 = vpop.f32.mrf.mxu0 }
 0x3ed   : > { %690 = vrot.lane.b32.xlu1 %v1021_v36, %s1383_s24 }
 0x3ee   : > { %v1088_v40 = vpop.f32.mrf.mxu0 }
 0x3f4   : > { %v797_v42 = vpop.f32.mrf.mxu0 }
 0x3f5   : > { %v804_v43 = vmul.f32 %v1213_v41, %v797_v42 }
 0x3f6   : > { %v1099_v44 = vpop.f32.mrf.mxu0 }
 0x3f7   : > { %v1022_v45 = vpack.c.bf16 %v804_v43, %v804_v43 }
 0x3f8   : > { %v800_v46 = vpop.f32.mrf.mxu0 }
 0x3f9   : > { %809 = vrot.lane.b32.xlu1 %v1022_v45, %s1384_s26 }
 0x3fa   : > { %v1100_v47 = vpop.f32.mrf.mxu0 }
 0x442   : > { %v572_v48 = vpop.permute.xlu0 %571 }
 0x443   : > { %575 = vst.msk [vmem:[#allocation2] sm:$0xf] %vm574_vm5, %v572_v48 }
 0x45f   : > { %v691_v49 = vpop.permute.xlu1 %690 }
 0x460   : > { %694 = vst.msk [vmem:[#allocation2] sm:$0xf] %vm693_vm6, %v691_v49 }
 0x46b   : > { %v810_v0 = vpop.permute.xlu1 %809 }
 0x46c   : > { %813 = vst.msk [vmem:[#allocation2] sm:$0xf] %vm812_vm7, %v810_v0 }
 0x473   : > { %v814_v50 = vld [vmem:[#allocation2] sm:$0xf] }
 0x474   : > { %1106 = vmatmul.mubr.msk.bf16.vlgmr.msra.gmra.mxu1 %vm295_vm1, %v814_v50 }
 0x534   : > { %v875_v52 = vpop.f32.mrf.mxu1 }
 0x535   : > { %v876_v53 = vadd.f32 %v1012_v51, %v875_v52 }
 0x536   : > { %v1107_v54 = vpop.f32.mrf.mxu1 }
 0x537   : > { %881 = vst.msk [vmem:[%s268_s12] sm:$0xff] %vm295_vm1, %v876_v53 }
 0x538   : > { %v878_v55 = vpop.f32.mrf.mxu1 }
 0x539   : > { %1307 = shalt.err (!%p1304_p9)
}
 0x53a   : > { %s1308_s17 = scalar_lea.hbm %s1628_s28, 128  ;;  %s1312_s26 = scalar_lea.hbm %s1677_s5, 256 }
 0x53b   : > { %p1309_p13 = scmp.ne.s32.totalorder %s1628_s28, %s1308_s17  ;;  %p1313_p4 = scmp.lt.s32.totalorder %s1628_s28, %s1677_s5 }
 0x53c   : > { %p1314_p8 = scmp.lt.s32.totalorder %s1312_s26, %s1308_s17 }
 0x53d   : > { %p1310_p5 = pnand %p1309_p13, %p1693_p0 }
 0x53e   : > { %p1315_p3 = por %p1314_p8, %p1313_p4 }
 0x53f   : > { %p1311_p10 = pneg %p1310_p5 }
 0x541   : > { %p1316_p11 = pnand %p1315_p3, %p1311_p10 }
 0x543   : > { %1319 = shalt.err (!%p1316_p11)
}
 0x544   : > { %1119 = dma.vmem_to_hbm [thread:$0]  (%p1693_p0), %s1630_s30, 128, %s1628_s28, %s883_s22   ;;  %v1108_v56 = vpop.f32.mrf.mxu1 }
 0x545 PF: > { %s908_s11 = sand.u32 1, %s1350_s18   ;;  %p1694_p1 = scmp.ne.s32.totalorder %s1683_s25, 0 }
 0x546   : > { %p1695_p2 = scmp.ge.s32.totalorder %s1362_s21, 2  ;;  %s909_s12 = scalar_lea.sflag [#allocation5], %s908_s11 }
 0x548   : > { %p1133_p6 = pnand %p1695_p2, %p1694_p1 }
 0x54a   : > { %p1134_p12 = pneg %p1133_p6 }
 0x54c   : > { %1345 = dma.done.wait (%p1134_p12), %s909_s12, 128  }
 0x54d   : > { %1347 = vsyncadd (%p1134_p12), %s909_s12, 4294967168  ;;  %p19_p7 = scmp.ge.s32.totalorder %s1488_s15, 4   ;;  %s1696_s18 = smov %s1354_s19 }
 0x54e   : > { %s1697_s19 = smov %s1358_s20  ;;  %s1698_s20 = smov %s1504_s27 }
 0x54f   : > { %s1699_s21 = smov %s1488_s15  ;;  %21 = sbr.rel (!%p19_p7) target bundleno = 6 (0x6), region = 93 }
 0x554   :  { %914 = vsyncpa [#allocation4], 1 }
 0x555   :  { %916 = vsyncpa [#allocation4 + $0x1], 1 }
 0x556   :  { %917 = vsyncpa [#allocation7], 1 }
 0x557   :  { %918 = vsyncpa [#allocation5], 1 }
 0x558   :  { %920 = vsyncpa [#allocation5 + $0x1], 1 }

</bundles_post_ra>
